<compile_context>
chip_gen: v7x
topology: tpu7x:2x2x1
jax: 0.10.0
libtpu: 0.0.40
codegen_flags: <defaults>
</compile_context>

<pallas_src>
import functools

import jax
import jax.numpy as jnp
from jax.experimental import pallas as pl
from jax.experimental.pallas import tpu as pltpu

BN_EPS = 1e-5
_LANE = 128


def _round_up(x, m):
    return -(-x // m) * m


def _vmem_budget_bytes():
    """Generation-aware VMEM budget (v7x: 64 MiB physical, v5e/v6e: 128 MiB)."""
    try:
        cap = int(pltpu.get_tpu_info().vmem_capacity_bytes)
    except Exception:
        cap = 64 * 1024 * 1024          # conservative (v7x) fallback
    limit = min(cap * 3 // 4, 100 * 1024 * 1024)   # 48 MiB on v7x, 96 MiB on v5e/v6e
    return max(limit, 24 * 1024 * 1024)


def _plan_tiles(N, Cin, Cout, HW, tile_budget_bytes,
                target_step_bytes=4 * 1024 * 1024, max_nb=64):
    """Pick (nb, hw_t, HWp): batch elems per step, spatial tile, padded H*W."""
    bytes_per_col = (Cin + Cout) * 4                         # x read + out write
    # columns/step so double-buffered in+out tiles fit the VMEM budget
    max_cols = max(_LANE, (tile_budget_bytes // (2 * bytes_per_col)) // _LANE * _LANE)
    want_cols = _round_up(max(1, target_step_bytes // bytes_per_col), _LANE)
    want_cols = max(_LANE, min(want_cols, max_cols))

    HWp = _round_up(HW, _LANE)
    if HWp <= want_cols:
        # Small spatial extent: one full-width tile, block batch elements.
        hw_t = HWp
        nb = max(1, min(N, want_cols // HWp, max_nb))
        while N % nb:                    # nb must divide N (grid divisibility)
            nb -= 1
    else:
        # Large spatial extent: big lane-dense tiles, one image per step.
        nb = 1
        hw_t = _LANE
        c = 2 * _LANE
        while c <= want_cols:            # largest pow2*128 tile, padding <= ~12.5%
            if _round_up(HW, c) * 8 <= HW * 9:
                hw_t = c
            c *= 2
        HWp = _round_up(HW, hw_t)
    return nb, hw_t, HWp


def _stats_kernel(x_ref, w_ref, sum_ref, sq_ref, *, nb):
    # x_ref:   (nb, Cin, hw_t)   NCHW view tile (padded columns are zero)
    # w_ref:   (Cout, Cin)       block-diagonal fused grouped-conv weight
    # sum/sq:  (1, Cout, 1)      per-batch-block partials (accumulated over t)
    @pl.when(pl.program_id(1) == 0)
    def _():
        sum_ref[...] = jnp.zeros_like(sum_ref)
        sq_ref[...] = jnp.zeros_like(sq_ref)

    w = w_ref[...]
    cout = w.shape[0]

    def one(n, carry):
        s1, s2 = carry
        y = jnp.dot(w, x_ref[n], preferred_element_type=jnp.float32)
        return (s1 + jnp.sum(y, axis=1, keepdims=True),
                s2 + jnp.sum(y * y, axis=1, keepdims=True))

    init = (jnp.zeros((cout, 1), jnp.float32), jnp.zeros((cout, 1), jnp.float32))
    if nb <= 8:                                   # short trip-count: unroll
        s1, s2 = init
        for n in range(nb):
            s1, s2 = one(n, (s1, s2))
    else:
        s1, s2 = jax.lax.fori_loop(0, nb, one, init)

    sum_ref[...] += s1[None]
    sq_ref[...] += s2[None]


def _apply_kernel(x_ref, w_ref, shift_ref, o_ref, *, nb):
    # x_ref:     (nb, Cin, hw_t)
    # w_ref:     (Cout, Cin)   BN scale already folded into the weight
    # shift_ref: (Cout, 1)     folded BN shift
    # o_ref:     (nb, Cout, hw_t)
    w = w_ref[...]
    shift = shift_ref[...]

    def one(n, carry):
        y = jnp.dot(w, x_ref[n], preferred_element_type=jnp.float32)
        # BN shift + ReLU; Dropout2d(p=0.0) is the identity.
        o_ref[n] = jnp.maximum(y + shift, 0.0).astype(o_ref.dtype)
        return carry

    if nb <= 8:
        for n in range(nb):
            one(n, 0)
    else:
        jax.lax.fori_loop(0, nb, one, 0)


@functools.partial(jax.jit, static_argnames=("groups",))
def graph_conv_layer(x_nchw, weight, bias, bn_gamma, bn_beta, *, groups=4):
    """Forward pass of GraphConvLayer (norm='batch', act='relu', drop=0.0).

    x_nchw:  (N, Cin, H, W) float32
    weight:  (Cout, Cin // groups) float32  (1x1 grouped conv kernel, squeezed)
    bias:    (Cout,) float32  (absorbed exactly by training-mode BatchNorm)
    bn_gamma, bn_beta: (Cout,) float32
    returns (N, Cout, H, W) float32
    """
    del bias  # no-op under train-mode BN (mean absorbs it; variance shift-invariant)
    N, Cin, H, W = x_nchw.shape
    Cout = weight.shape[0]
    G = groups
    assert Cin % G == 0 and Cout % G == 0
    ICg, OCg = Cin // G, Cout // G
    HW = H * W

    vmem_limit = _vmem_budget_bytes()
    tile_budget = vmem_limit - 4 * 1024 * 1024          # headroom: weights/internal
    nb, hw_t, HWp = _plan_tiles(N, Cin, Cout, HW, tile_budget)
    NB, T = N // nb, HWp // hw_t

    # Free view (no HBM transpose); zero-pad the spatial dim to the tile grid.
    x = x_nchw.reshape(N, Cin, HW)
    if HWp != HW:
        x = jnp.pad(x, ((0, 0), (0, 0), (0, HWp - HW)))

    # Block-diagonal fused grouped-conv weight, oriented (Cout, Cin).
    wg = weight.reshape(G, OCg, ICg)
    rows = []
    for g in range(G):
        blocks = [wg[g] if h == g else jnp.zeros((OCg, ICg), weight.dtype)
                  for h in range(G)]
        rows.append(jnp.concatenate(blocks, axis=1))
    w_full = jnp.concatenate(rows, axis=0).astype(jnp.float32)   # (Cout, Cin)

    cp_stats = pltpu.CompilerParams(
        dimension_semantics=("parallel", "arbitrary"),
        vmem_limit_bytes=vmem_limit)
    cp_apply = pltpu.CompilerParams(
        dimension_semantics=("parallel", "parallel"),   # v7x megacore-shardable
        vmem_limit_bytes=vmem_limit)

    # -------- pass 1: per-batch-block BN partial statistics of y = W @ x -----
    sum_p, sq_p = pl.pallas_call(
        functools.partial(_stats_kernel, nb=nb),
        out_shape=(jax.ShapeDtypeStruct((NB, Cout, 1), jnp.float32),
                   jax.ShapeDtypeStruct((NB, Cout, 1), jnp.float32)),
        grid=(NB, T),
        in_specs=[
            pl.BlockSpec((nb, Cin, hw_t), lambda b, t: (b, 0, t)),
            pl.BlockSpec((Cout, Cin), lambda b, t: (0, 0)),
        ],
        out_specs=(pl.BlockSpec((1, Cout, 1), lambda b, t: (b, 0, 0)),
                   pl.BlockSpec((1, Cout, 1), lambda b, t: (b, 0, 0))),
        compiler_params=cp_stats,
    )(x, w_full)

    # -------- tiny XLA glue: fold BN into weight/shift ------------------------
    inv_n = 1.0 / float(N * HW)                 # real (unpadded) element count
    s1 = jnp.sum(sum_p[:, :, 0], axis=0)        # (Cout,)
    s2 = jnp.sum(sq_p[:, :, 0], axis=0)
    mean = s1 * inv_n
    var = jnp.maximum(s2 * inv_n - mean * mean, 0.0)
    scale = bn_gamma.astype(jnp.float32) * jax.lax.rsqrt(var + BN_EPS)
    shift = (bn_beta.astype(jnp.float32) - mean * scale).reshape(Cout, 1)
    w_scaled = w_full * scale[:, None]          # fold BN scale into the weight

    # -------- pass 2: conv + BN shift + ReLU (embarrassingly parallel) -------
    out = pl.pallas_call(
        functools.partial(_apply_kernel, nb=nb),
        out_shape=jax.ShapeDtypeStruct((N, Cout, HWp), jnp.float32),
        grid=(NB, T),
        in_specs=[
            pl.BlockSpec((nb, Cin, hw_t), lambda b, t: (b, 0, t)),
            pl.BlockSpec((Cout, Cin), lambda b, t: (0, 0)),
            pl.BlockSpec((Cout, 1), lambda b, t: (0, 0)),
        ],
        out_specs=pl.BlockSpec((nb, Cout, hw_t), lambda b, t: (b, 0, t)),
        compiler_params=cp_apply,
    )(x, w_scaled, shift)

    if HWp != HW:
        out = out[:, :, :HW]
    return out.reshape(N, Cout, H, W)


def _reference(x_nchw, weight, bias, bn_gamma, bn_beta, groups=4):
    """Pure-JAX reference mirroring PyTorch semantics (training-mode BN)."""
    N, Cin, H, W = x_nchw.shape
    Cout = weight.shape[0]
    G, ICg, OCg = groups, Cin // groups, Cout // groups
    xg = x_nchw.reshape(N, G, ICg, H, W)
    wg = weight.reshape(G, OCg, ICg)
    y = jnp.einsum("ngihw,goi->ngohw", xg, wg).reshape(N, Cout, H, W)
    y = y + bias[None, :, None, None]
    mean = jnp.mean(y, axis=(0, 2, 3), keepdims=True)
    var = jnp.mean((y - mean) ** 2, axis=(0, 2, 3), keepdims=True)
    y = (y - mean) / jnp.sqrt(var + BN_EPS)
    y = y * bn_gamma[None, :, None, None] + bn_beta[None, :, None, None]
    return jnp.maximum(y, 0.0)


if __name__ == "__main__":
    # Small shapes consistent with the module (channels divisible by groups=4).
    N, Cin, Cout, H, W = 2, 8, 16, 16, 16
    G = 4

    key = jax.random.PRNGKey(0)
    kx, kw, kb = jax.random.split(key, 3)

    x = jax.random.normal(kx, (N, Cin, H, W), dtype=jnp.float32)
    # Conv2d(Cin, Cout, 1, groups=4) weight: (Cout, Cin//G, 1, 1) -> squeeze k=1
    weight = 0.2 * jax.random.normal(kw, (Cout, Cin // G), dtype=jnp.float32)
    bias = 0.1 * jax.random.normal(kb, (Cout,), dtype=jnp.float32)
    # BatchNorm2d default init: gamma=1, beta=0
    bn_gamma = jnp.ones((Cout,), dtype=jnp.float32)
    bn_beta = jnp.zeros((Cout,), dtype=jnp.float32)

    out = graph_conv_layer(x, weight, bias, bn_gamma, bn_beta, groups=G)
    out = jax.block_until_ready(out)

    ref = _reference(x, weight, bias, bn_gamma, bn_beta, groups=G)
    assert out.shape == (N, Cout, H, W)
    assert jnp.allclose(out, ref, atol=1e-3, rtol=1e-3), "mismatch vs reference"

    print("KERNEL_OK")
</pallas_src>

<mosaic_0001>
module attributes {stable_mosaic.version = 11 : i64} {
  func.func @_stats_kernel(%arg0: i32, %arg1: i32, %arg2: memref<2x8x256xf32, #tpu.memory_space<vmem>>, %arg3: memref<16x8xf32, #tpu.memory_space<vmem>>, %arg4: memref<1x16x1xf32, #tpu.memory_space<vmem>>, %arg5: memref<1x16x1xf32, #tpu.memory_space<vmem>>) attributes {dimension_semantics = [#tpu.dimension_semantics<parallel>, #tpu.dimension_semantics<arbitrary>], iteration_bounds = array<i64: 1, 1>, scalar_prefetch = 0 : i64, scratch_operands = 0 : i64, tpu.core_type = #tpu.core_type<tc>, window_params = [{transform_indices = @transform_0, window_bounds = array<i64: 2, 8, 256>}, {pipeline_mode = #tpu.pipeline_mode<synchronous>, transform_indices = @transform_1, window_bounds = array<i64: 16, 8>}, {transform_indices = @transform_2, window_bounds = array<i64: 1, 16, 1>}, {transform_indices = @transform_3, window_bounds = array<i64: 1, 16, 1>}]} {
    %c0_i32 = arith.constant 0 : i32
    %0 = arith.cmpi eq, %arg1, %c0_i32 : i32
    %1 = arith.extui %0 : i1 to i32
    %c0_i32_0 = arith.constant 0 : i32
    %2 = arith.cmpi ne, %1, %c0_i32_0 : i32
    scf.if %2 {
      %cst_26 = arith.constant 0.000000e+00 : f32
      %34 = vector.broadcast %cst_26 : f32 to vector<1x16x1xf32>
      %c0_27 = arith.constant 0 : index
      %c0_28 = arith.constant 0 : index
      %c0_29 = arith.constant 0 : index
      %35 = vector.load %arg4[%c0_27, %c0_28, %c0_29] : memref<1x16x1xf32, #tpu.memory_space<vmem>>, vector<1x16x1xf32>
      tpu.vector_store %arg4[%c0_27, %c0_28, %c0_29], %34 {strides = array<i32>} : memref<1x16x1xf32, #tpu.memory_space<vmem>>, vector<1x16x1xf32>,
      %cst_30 = arith.constant 0.000000e+00 : f32
      %36 = vector.broadcast %cst_30 : f32 to vector<1x16x1xf32>
      %c0_31 = arith.constant 0 : index
      %c0_32 = arith.constant 0 : index
      %c0_33 = arith.constant 0 : index
      %37 = vector.load %arg5[%c0_31, %c0_32, %c0_33] : memref<1x16x1xf32, #tpu.memory_space<vmem>>, vector<1x16x1xf32>
      tpu.vector_store %arg5[%c0_31, %c0_32, %c0_33], %36 {strides = array<i32>} : memref<1x16x1xf32, #tpu.memory_space<vmem>>, vector<1x16x1xf32>,
    } else {
    }
    %c0 = arith.constant 0 : index
    %c0_1 = arith.constant 0 : index
    %3 = vector.load %arg3[%c0, %c0_1] : memref<16x8xf32, #tpu.memory_space<vmem>>, vector<16x8xf32>
    %cst = arith.constant 0.000000e+00 : f32
    %4 = vector.broadcast %cst : f32 to vector<16x1xf32>
    %cst_2 = arith.constant 0.000000e+00 : f32
    %5 = vector.broadcast %cst_2 : f32 to vector<16x1xf32>
    %c0_3 = arith.constant 0 : index
    %c0_4 = arith.constant 0 : index
    %c0_5 = arith.constant 0 : index
    %6 = vector.load %arg2[%c0_3, %c0_4, %c0_5] : memref<2x8x256xf32, #tpu.memory_space<vmem>>, vector<1x8x256xf32>
    %7 = vector.shape_cast %6 : vector<1x8x256xf32> to vector<8x256xf32>
    %cst_6 = arith.constant dense<0.000000e+00> : vector<16x256xf32>
    %8 = tpu.matmul %3, %7, %cst_6 {dimension_numbers = #tpu.dot_dimension_numbers<[1], [0], [0], [1], [0, 0, 1, 1], [], []>} : vector<16x8xf32>, vector<8x256xf32>, vector<16x256xf32> -> vector<16x256xf32>
    %cst_7 = arith.constant dense<0.000000e+00> : vector<16xf32>
    %9 = vector.multi_reduction <add>, %8, %cst_7 [1] : vector<16x256xf32> to vector<16xf32>
    %10 = vector.shape_cast %9 : vector<16xf32> to vector<16x1xf32>
    %11 = arith.addf %4, %10 : vector<16x1xf32>
    %12 = arith.mulf %8, %8 : vector<16x256xf32>
    %cst_8 = arith.constant dense<0.000000e+00> : vector<16xf32>
    %13 = vector.multi_reduction <add>, %12, %cst_8 [1] : vector<16x256xf32> to vector<16xf32>
    %14 = vector.shape_cast %13 : vector<16xf32> to vector<16x1xf32>
    %15 = arith.addf %5, %14 : vector<16x1xf32>
    %c1 = arith.constant 1 : index
    %c0_9 = arith.constant 0 : index
    %c0_10 = arith.constant 0 : index
    %16 = vector.load %arg2[%c1, %c0_9, %c0_10] : memref<2x8x256xf32, #tpu.memory_space<vmem>>, vector<1x8x256xf32>
    %17 = vector.shape_cast %16 : vector<1x8x256xf32> to vector<8x256xf32>
    %cst_11 = arith.constant dense<0.000000e+00> : vector<16x256xf32>
    %18 = tpu.matmul %3, %17, %cst_11 {dimension_numbers = #tpu.dot_dimension_numbers<[1], [0], [0], [1], [0, 0, 1, 1], [], []>} : vector<16x8xf32>, vector<8x256xf32>, vector<16x256xf32> -> vector<16x256xf32>
    %cst_12 = arith.constant dense<0.000000e+00> : vector<16xf32>
    %19 = vector.multi_reduction <add>, %18, %cst_12 [1] : vector<16x256xf32> to vector<16xf32>
    %20 = vector.shape_cast %19 : vector<16xf32> to vector<16x1xf32>
    %21 = arith.addf %11, %20 : vector<16x1xf32>
    %22 = arith.mulf %18, %18 : vector<16x256xf32>
    %cst_13 = arith.constant dense<0.000000e+00> : vector<16xf32>
    %23 = vector.multi_reduction <add>, %22, %cst_13 [1] : vector<16x256xf32> to vector<16xf32>
    %24 = vector.shape_cast %23 : vector<16xf32> to vector<16x1xf32>
    %25 = arith.addf %15, %24 : vector<16x1xf32>
    %c0_14 = arith.constant 0 : index
    %c0_15 = arith.constant 0 : index
    %c0_16 = arith.constant 0 : index
    %26 = vector.load %arg4[%c0_14, %c0_15, %c0_16] : memref<1x16x1xf32, #tpu.memory_space<vmem>>, vector<1x16x1xf32>
    %27 = vector.shape_cast %21 : vector<16x1xf32> to vector<1x16x1xf32>
    %28 = arith.addf %26, %27 : vector<1x16x1xf32>
    %c0_17 = arith.constant 0 : index
    %c0_18 = arith.constant 0 : index
    %c0_19 = arith.constant 0 : index
    %29 = vector.load %arg4[%c0_17, %c0_18, %c0_19] : memref<1x16x1xf32, #tpu.memory_space<vmem>>, vector<1x16x1xf32>
    tpu.vector_store %arg4[%c0_17, %c0_18, %c0_19], %28 {strides = array<i32>} : memref<1x16x1xf32, #tpu.memory_space<vmem>>, vector<1x16x1xf32>,
    %c0_20 = arith.constant 0 : index
    %c0_21 = arith.constant 0 : index
    %c0_22 = arith.constant 0 : index
    %30 = vector.load %arg5[%c0_20, %c0_21, %c0_22] : memref<1x16x1xf32, #tpu.memory_space<vmem>>, vector<1x16x1xf32>
    %31 = vector.shape_cast %25 : vector<16x1xf32> to vector<1x16x1xf32>
    %32 = arith.addf %30, %31 : vector<1x16x1xf32>
    %c0_23 = arith.constant 0 : index
    %c0_24 = arith.constant 0 : index
    %c0_25 = arith.constant 0 : index
    %33 = vector.load %arg5[%c0_23, %c0_24, %c0_25] : memref<1x16x1xf32, #tpu.memory_space<vmem>>, vector<1x16x1xf32>
    tpu.vector_store %arg5[%c0_23, %c0_24, %c0_25], %32 {strides = array<i32>} : memref<1x16x1xf32, #tpu.memory_space<vmem>>, vector<1x16x1xf32>,
    return
  }
  func.func @transform_0(%arg0: i32, %arg1: i32) -> (i32, i32, i32) {
    %c0_i32 = arith.constant 0 : i32
    %c0_i32_0 = arith.constant 0 : i32
    return %arg0, %c0_i32, %arg1 : i32, i32, i32
  }
  func.func @transform_1(%arg0: i32, %arg1: i32) -> (i32, i32) {
    %c0_i32 = arith.constant 0 : i32
    %c0_i32_0 = arith.constant 0 : i32
    %c0_i32_1 = arith.constant 0 : i32
    return %c0_i32, %c0_i32_0 : i32, i32
  }
  func.func @transform_2(%arg0: i32, %arg1: i32) -> (i32, i32, i32) {
    %c0_i32 = arith.constant 0 : i32
    %c0_i32_0 = arith.constant 0 : i32
    %c0_i32_1 = arith.constant 0 : i32
    return %arg0, %c0_i32, %c0_i32_0 : i32, i32, i32
  }
  func.func @transform_3(%arg0: i32, %arg1: i32) -> (i32, i32, i32) {
    %c0_i32 = arith.constant 0 : i32
    %c0_i32_0 = arith.constant 0 : i32
    %c0_i32_1 = arith.constant 0 : i32
    return %arg0, %c0_i32, %c0_i32_0 : i32, i32, i32
  }
}

module attributes {stable_mosaic.version = 11 : i64} {
  func.func @_apply_kernel(%arg0: i32, %arg1: i32, %arg2: memref<2x8x256xf32, #tpu.memory_space<vmem>>, %arg3: memref<16x8xf32, #tpu.memory_space<vmem>>, %arg4: memref<16x1xf32, #tpu.memory_space<vmem>>, %arg5: memref<2x16x256xf32, #tpu.memory_space<vmem>>) attributes {dimension_semantics = [#tpu.dimension_semantics<parallel>, #tpu.dimension_semantics<parallel>], iteration_bounds = array<i64: 1, 1>, scalar_prefetch = 0 : i64, scratch_operands = 0 : i64, tpu.core_type = #tpu.core_type<tc>, window_params = [{transform_indices = @transform_0, window_bounds = array<i64: 2, 8, 256>}, {pipeline_mode = #tpu.pipeline_mode<synchronous>, transform_indices = @transform_1, window_bounds = array<i64: 16, 8>}, {pipeline_mode = #tpu.pipeline_mode<synchronous>, transform_indices = @transform_2, window_bounds = array<i64: 16, 1>}, {transform_indices = @transform_3, window_bounds = array<i64: 2, 16, 256>}]} {
    %c0 = arith.constant 0 : index
    %c0_0 = arith.constant 0 : index
    %0 = vector.load %arg3[%c0, %c0_0] : memref<16x8xf32, #tpu.memory_space<vmem>>, vector<16x8xf32>
    %c0_1 = arith.constant 0 : index
    %c0_2 = arith.constant 0 : index
    %1 = vector.load %arg4[%c0_1, %c0_2] : memref<16x1xf32, #tpu.memory_space<vmem>>, vector<16x1xf32>
    %c0_3 = arith.constant 0 : index
    %c0_4 = arith.constant 0 : index
    %c0_5 = arith.constant 0 : index
    %2 = vector.load %arg2[%c0_3, %c0_4, %c0_5] : memref<2x8x256xf32, #tpu.memory_space<vmem>>, vector<1x8x256xf32>
    %3 = vector.shape_cast %2 : vector<1x8x256xf32> to vector<8x256xf32>
    %cst = arith.constant dense<0.000000e+00> : vector<16x256xf32>
    %4 = tpu.matmul %0, %3, %cst {dimension_numbers = #tpu.dot_dimension_numbers<[1], [0], [0], [1], [0, 0, 1, 1], [], []>} : vector<16x8xf32>, vector<8x256xf32>, vector<16x256xf32> -> vector<16x256xf32>
    %5 = vector.broadcast %1 : vector<16x1xf32> to vector<16x256xf32>
    %6 = arith.addf %4, %5 : vector<16x256xf32>
    %cst_6 = arith.constant 0.000000e+00 : f32
    %7 = vector.broadcast %cst_6 : f32 to vector<16x256xf32>
    %8 = arith.maximumf %6, %7 : vector<16x256xf32>
    %c0_7 = arith.constant 0 : index
    %c0_8 = arith.constant 0 : index
    %c0_9 = arith.constant 0 : index
    %9 = vector.load %arg5[%c0_7, %c0_8, %c0_9] : memref<2x16x256xf32, #tpu.memory_space<vmem>>, vector<1x16x256xf32>
    %10 = vector.shape_cast %9 : vector<1x16x256xf32> to vector<16x256xf32>
    %11 = vector.shape_cast %8 : vector<16x256xf32> to vector<1x16x256xf32>
    tpu.vector_store %arg5[%c0_7, %c0_8, %c0_9], %11 {strides = array<i32>} : memref<2x16x256xf32, #tpu.memory_space<vmem>>, vector<1x16x256xf32>,
    %c1 = arith.constant 1 : index
    %c0_10 = arith.constant 0 : index
    %c0_11 = arith.constant 0 : index
    %12 = vector.load %arg2[%c1, %c0_10, %c0_11] : memref<2x8x256xf32, #tpu.memory_space<vmem>>, vector<1x8x256xf32>
    %13 = vector.shape_cast %12 : vector<1x8x256xf32> to vector<8x256xf32>
    %cst_12 = arith.constant dense<0.000000e+00> : vector<16x256xf32>
    %14 = tpu.matmul %0, %13, %cst_12 {dimension_numbers = #tpu.dot_dimension_numbers<[1], [0], [0], [1], [0, 0, 1, 1], [], []>} : vector<16x8xf32>, vector<8x256xf32>, vector<16x256xf32> -> vector<16x256xf32>
    %15 = vector.broadcast %1 : vector<16x1xf32> to vector<16x256xf32>
    %16 = arith.addf %14, %15 : vector<16x256xf32>
    %cst_13 = arith.constant 0.000000e+00 : f32
    %17 = vector.broadcast %cst_13 : f32 to vector<16x256xf32>
    %18 = arith.maximumf %16, %17 : vector<16x256xf32>
    %c1_14 = arith.constant 1 : index
    %c0_15 = arith.constant 0 : index
    %c0_16 = arith.constant 0 : index
    %19 = vector.load %arg5[%c1_14, %c0_15, %c0_16] : memref<2x16x256xf32, #tpu.memory_space<vmem>>, vector<1x16x256xf32>
    %20 = vector.shape_cast %19 : vector<1x16x256xf32> to vector<16x256xf32>
    %21 = vector.shape_cast %18 : vector<16x256xf32> to vector<1x16x256xf32>
    tpu.vector_store %arg5[%c1_14, %c0_15, %c0_16], %21 {strides = array<i32>} : memref<2x16x256xf32, #tpu.memory_space<vmem>>, vector<1x16x256xf32>,
    return
  }
  func.func @transform_0(%arg0: i32, %arg1: i32) -> (i32, i32, i32) {
    %c0_i32 = arith.constant 0 : i32
    %c0_i32_0 = arith.constant 0 : i32
    return %arg0, %c0_i32, %arg1 : i32, i32, i32
  }
  func.func @transform_1(%arg0: i32, %arg1: i32) -> (i32, i32) {
    %c0_i32 = arith.constant 0 : i32
    %c0_i32_0 = arith.constant 0 : i32
    %c0_i32_1 = arith.constant 0 : i32
    return %c0_i32, %c0_i32_0 : i32, i32
  }
  func.func @transform_2(%arg0: i32, %arg1: i32) -> (i32, i32) {
    %c0_i32 = arith.constant 0 : i32
    %c0_i32_0 = arith.constant 0 : i32
    %c0_i32_1 = arith.constant 0 : i32
    return %c0_i32, %c0_i32_0 : i32, i32
  }
  func.func @transform_3(%arg0: i32, %arg1: i32) -> (i32, i32, i32) {
    %c0_i32 = arith.constant 0 : i32
    %c0_i32_0 = arith.constant 0 : i32
    return %arg0, %c0_i32, %arg1 : i32, i32, i32
  }
}

</mosaic_0001>

<bundles_post_ra>
// kernel: graph_conv_layer.2
= control target key start
LH: loop header
LB: loop body
LE: loop exit
PB: predicated region body
PF: predicated region fallthrough
CT: control target
= control target key end

     0   :  { %v258_v2 = vmov 0.0   ;;  %vm26_vm0 = vcmask 64512   ;;  %vm17_vm1 = vcmask 7168   ;;  %s341_s0 = inlined_call_operand.vmem [shape: f32[2,8,256], index: 0, kind: input, shape index: {}]   ;;  %s342_s1 = inlined_call_operand.vmem [shape: f32[16,8], index: 1, kind: input, shape index: {}]   ;;  %s343_s2 = inlined_call_operand.vmem [shape: f32[1,16,1], index: 2, kind: output, shape index: {0}]   ;;  %s344_s3 = inlined_call_operand.vmem [shape: f32[1,16,1], index: 3, kind: output, shape index: {1}]  }
   0x1   :  { %v25_v0 = vld [vmem:[%s341_s0 + $0x8] sm:$0xff]  ;;  %v24_v1 = vld [vmem:[%s341_s0] sm:$0xff]  ;;  %97 = vmatprep.mubr.f32.mxu0 %v258_v2  ;;  %v254_v3 = vld [vmem:[%s341_s0 + $0x18] sm:$0xff]  ;;  %197 = vmatprep.mubr.f32.mxu1 %v258_v2  ;;  %18 = vst.msk [vmem:[%s343_s2] sm:$0xff] %vm17_vm1, %v258_v2 }
   0x2   :  { %33 = vmatprep.subr.mxu0 %v25_v0  ;;  %133 = vmatprep.subr.mxu1 %v254_v3  ;;  %v22_v4 = vld [vmem:[%s342_s1] sm:$0xff]  ;;  %v253_v5 = vld [vmem:[%s341_s0 + $0x10] sm:$0xff]  ;;  %v23_v6 = vld [vmem:[%s342_s1 + $0x8] sm:$0xff]  ;;  %19 = vst.msk [vmem:[%s343_s2 + $0x8] sm:$0xff] %vm17_vm1, %v258_v2 }
   0x3   :  { %34 = vmatpush1.msra.mxu0 %v24_v1  ;;  %134 = vmatpush1.msra.mxu1 %v253_v5  ;;  %20 = vst.msk [vmem:[%s344_s3] sm:$0xff] %vm17_vm1, %v258_v2  ;;  %21 = vst.msk [vmem:[%s344_s3 + $0x8] sm:$0xff] %vm17_vm1, %v258_v2 }
   0x4   :  { %251 = vmatmul.mubr.msk.f32.vlgmr.msra.gmra.mrb[0].mxu0 %vm26_vm0, %v22_v4  ;;  %255 = vmatmul.mubr.msk.f32.vlgmr.msra.gmra.mrb[0].mxu1 %vm26_vm0, %v22_v4 }
   0x5   :  { %203 = vmatprep.mubr.f32.mxu1 %v258_v2  ;;  %103 = vmatprep.mubr.f32.mxu0 %v258_v2 }
   0x8   :  { %256 = vmatmul.mubr.msk.f32.gmra.mrb[2].mxu1 %vm26_vm0, %v23_v6  ;;  %252 = vmatmul.mubr.msk.f32.gmra.mrb[2].mxu0 %vm26_vm0, %v23_v6  ;;  %v230_v33 = vld [vmem:[%s343_s2] sm:$0xff] }
   0x9   :  { %v231_v38 = vld [vmem:[%s343_s2 + $0x8] sm:$0xff] }
   0xa   :  { %v237_v43 = vld [vmem:[%s344_s3] sm:$0xff]  ;;  %v238_v46 = vld [vmem:[%s344_s3 + $0x8] sm:$0xff] }
  0xd7   :  { %v99_v7 = vpop.f32.mrb[0].mxu0  ;;  %v199_v8 = vpop.f32.mrb[0].mxu1 }
  0xd8   :  { %v118_v9 = vmul.f32 %v99_v7, %v99_v7  ;;  %v101_v10 = vpop.f32.mrb[1].mxu0  ;;  %v218_v11 = vmul.f32 %v199_v8, %v199_v8  ;;  %v201_v12 = vpop.f32.mrb[1].mxu1 }
  0xd9   :  { %v119_v13 = vmul.f32 %v101_v10, %v101_v10  ;;  %v219_v14 = vmul.f32 %v201_v12, %v201_v12  ;;  %v110_v15 = vadd.f32 %v101_v10, %v99_v7  ;;  %v210_v16 = vadd.f32 %v201_v12, %v199_v8 }
  0xdb   :  { %111 = vadd.xlane.f32.xlu0 %v110_v15  ;;  %v205_v17 = vpop.f32.mrb[2].mxu1  ;;  %v122_v18 = vadd.f32 %v119_v13, %v118_v9  ;;  %v105_v19 = vpop.f32.mrb[2].mxu0  ;;  %v222_v20 = vadd.f32 %v219_v14, %v218_v11 }
  0xdc   :  { %v220_v21 = vmul.f32 %v205_v17, %v205_v17  ;;  %v207_v22 = vpop.f32.mrb[3].mxu1  ;;  %v120_v23 = vmul.f32 %v105_v19, %v105_v19  ;;  %v107_v24 = vpop.f32.mrb[3].mxu0 }
  0xdd   :  { %v213_v25 = vadd.f32 %v207_v22, %v205_v17  ;;  %v221_v26 = vmul.f32 %v207_v22, %v207_v22  ;;  %123 = vadd.xlane.f32.xlu1 %v122_v18  ;;  %v113_v27 = vadd.f32 %v107_v24, %v105_v19  ;;  %v121_v28 = vmul.f32 %v107_v24, %v107_v24 }
  0xdf   :  { %211 = vadd.xlane.f32.xlu0 %v210_v16  ;;  %v125_v29 = vadd.f32 %v121_v28, %v120_v23  ;;  %v225_v30 = vadd.f32 %v221_v26, %v220_v21 }
  0xe1   :  { %214 = vadd.xlane.f32.xlu1 %v213_v25 }
  0xe3   :  { %114 = vadd.xlane.f32.xlu0 %v113_v27 }
  0xe5   :  { %126 = vadd.xlane.f32.xlu1 %v125_v29 }
  0xe7   :  { %223 = vadd.xlane.f32.xlu0 %v222_v20 }
  0xe9   :  { %226 = vadd.xlane.f32.xlu1 %v225_v30 }
 0x168   :  { %v112_v31 = vpop.xlane.xlu0 %111 }
 0x16a   :  { %v124_v32 = vpop.xlane.xlu1 %123 }
 0x16c   :  { %v212_v34 = vpop.xlane.xlu0 %211 }
 0x16d   :  { %v216_v35 = vadd.f32 %v212_v34, %v112_v31 }
 0x16e   :  { %v215_v36 = vpop.xlane.xlu1 %214 }
 0x16f   :  { %v232_v37 = vadd.f32 %v230_v33, %v216_v35 }
 0x170   :  { %v115_v39 = vpop.xlane.xlu0 %114 }
 0x171   :  { %235 = vst.msk [vmem:[%s343_s2] sm:$0xff] %vm17_vm1, %v232_v37  ;;  %v217_v40 = vadd.f32 %v215_v36, %v115_v39 }
 0x172   :  { %v127_v41 = vpop.xlane.xlu1 %126 }
 0x173   :  { %v233_v42 = vadd.f32 %v231_v38, %v217_v40 }
 0x174   :  { %v224_v44 = vpop.xlane.xlu0 %223 }
 0x175   :  { %236 = vst.msk [vmem:[%s343_s2 + $0x8] sm:$0xff] %vm17_vm1, %v233_v42  ;;  %v228_v45 = vadd.f32 %v224_v44, %v124_v32 }
 0x176   :  { %v227_v47 = vpop.xlane.xlu1 %226 }
 0x177   :  { %v239_v48 = vadd.f32 %v237_v43, %v228_v45  ;;  %v229_v49 = vadd.f32 %v227_v47, %v127_v41 }
 0x179   :  { %241 = vst.msk [vmem:[%s344_s3] sm:$0xff] %vm17_vm1, %v239_v48  ;;  %v240_v50 = vadd.f32 %v238_v46, %v229_v49 }
 0x17b   :  { %242 = vst.msk [vmem:[%s344_s3 + $0x8] sm:$0xff] %vm17_vm1, %v240_v50 }

// kernel: graph_conv_layer.3
= control target key start
LH: loop header
LB: loop body
LE: loop exit
PB: predicated region body
PF: predicated region fallthrough
CT: control target
= control target key end

     0   :  { %v228_v3 = vmov 0.0   ;;  %vm30_vm0 = vcmask 64512   ;;  %v229_v8 = vmov 0   ;;  %s302_s0 = inlined_call_operand.vmem [shape: f32[2,8,256], index: 0, kind: input, shape index: {}]   ;;  %s303_s1 = inlined_call_operand.vmem [shape: f32[16,8], index: 1, kind: input, shape index: {}]   ;;  %s304_s2 = inlined_call_operand.vmem [shape: f32[16,1], index: 2, kind: input, shape index: {}]   ;;  %s305_s3 = inlined_call_operand.vmem [shape: f32[2,16,256], index: 3, kind: output, shape index: {}]  }
   0x1   :  { %v19_v0 = vld [vmem:[%s302_s0 + $0x8] sm:$0xff]  ;;  %v218_v1 = vld [vmem:[%s302_s0 + $0x18] sm:$0xff]  ;;  %v18_v2 = vld [vmem:[%s302_s0] sm:$0xff]  ;;  %101 = vmatprep.mubr.f32.mxu0 %v228_v3  ;;  %189 = vmatprep.mubr.f32.mxu1 %v228_v3 }
   0x2   :  { %37 = vmatprep.subr.mxu0 %v19_v0  ;;  %125 = vmatprep.subr.mxu1 %v218_v1  ;;  %v217_v4 = vld [vmem:[%s302_s0 + $0x10] sm:$0xff]  ;;  %v14_v5 = vld [vmem:[%s303_s1] sm:$0xff]  ;;  %v15_v7 = vld [vmem:[%s303_s1 + $0x8] sm:$0xff] }
   0x3   :  { %38 = vmatpush1.msra.mxu0 %v18_v2  ;;  %126 = vmatpush1.msra.mxu1 %v217_v4  ;;  %v16_v6 = vld [vmem:[%s304_s2] sm:$0xff]  ;;  %v17_v9 = vld [vmem:[%s304_s2 + $0x8] sm:$0xff] }
   0x4   :  { %215 = vmatmul.mubr.msk.f32.vlgmr.msra.gmra.mrb[0].mxu0 %vm30_vm0, %v14_v5  ;;  %219 = vmatmul.mubr.msk.f32.vlgmr.msra.gmra.mrb[0].mxu1 %vm30_vm0, %v14_v5 }
   0x5   :  { %107 = vmatprep.mubr.f32.mxu0 %v228_v3  ;;  %195 = vmatprep.mubr.f32.mxu1 %v228_v3 }
   0x6   :  { %227 = vset.pattern.permute.xlu0 %v229_v8 }
   0x7   :  { %22 = vperm.xlu0 %227, %v16_v6  }
   0x8   :  { %216 = vmatmul.mubr.msk.f32.gmra.mrb[2].mxu0 %vm30_vm0, %v15_v7  ;;  %220 = vmatmul.mubr.msk.f32.gmra.mrb[2].mxu1 %vm30_vm0, %v15_v7 }
   0xb   :  { %27 = vperm.xlu0 %227, %v17_v9  }
  0x86   :  { %v23_v10 = vpop.permute.xlu0 %22 }
  0x8a   :  { %v28_v21 = vpop.permute.xlu0 %27 }
  0xd7   :  { %v103_v11 = vpop.f32.mrb[0].mxu0  ;;  %v191_v12 = vpop.f32.mrb[0].mxu1 }
  0xd8   :  { %v104_v13 = vadd.f32 %v103_v11, %v23_v10  ;;  %v192_v14 = vadd.f32 %v191_v12, %v23_v10  ;;  %v105_v15 = vpop.f32.mrb[1].mxu0  ;;  %v193_v16 = vpop.f32.mrb[1].mxu1 }
  0xd9   :  { %v106_v17 = vadd.f32 %v105_v15, %v23_v10  ;;  %v194_v18 = vadd.f32 %v193_v16, %v23_v10 }
  0xda   :  { %v114_v19 = vmax.f32 %v104_v13, 0.0  ;;  %v202_v20 = vmax.f32 %v192_v14, 0.0 }
  0xdb   :  { %v115_v22 = vmax.f32 %v106_v17, 0.0  ;;  %v203_v23 = vmax.f32 %v194_v18, 0.0  ;;  %v109_v24 = vpop.f32.mrb[2].mxu0  ;;  %v197_v25 = vpop.f32.mrb[2].mxu1 }
  0xdc   :  { %118 = vst [vmem:[%s305_s3] sm:$0xff] %v114_v19  ;;  %221 = vst [vmem:[%s305_s3 + $0x20] sm:$0xff] %v202_v20  ;;  %v110_v26 = vadd.f32 %v109_v24, %v28_v21  ;;  %v198_v27 = vadd.f32 %v197_v25, %v28_v21  ;;  %v111_v28 = vpop.f32.mrb[3].mxu0  ;;  %v199_v29 = vpop.f32.mrb[3].mxu1 }
  0xdd   :  { %119 = vst [vmem:[%s305_s3 + $0x8] sm:$0xff] %v115_v22  ;;  %222 = vst [vmem:[%s305_s3 + $0x28] sm:$0xff] %v203_v23  ;;  %v112_v30 = vadd.f32 %v111_v28, %v28_v21  ;;  %v200_v31 = vadd.f32 %v199_v29, %v28_v21 }
  0xde   :  { %v116_v32 = vmax.f32 %v110_v26, 0.0  ;;  %v204_v33 = vmax.f32 %v198_v27, 0.0 }
  0xdf   :  { %v117_v34 = vmax.f32 %v112_v30, 0.0  ;;  %v205_v35 = vmax.f32 %v200_v31, 0.0 }
  0xe0   :  { %120 = vst [vmem:[%s305_s3 + $0x10] sm:$0xff] %v116_v32  ;;  %223 = vst [vmem:[%s305_s3 + $0x30] sm:$0xff] %v204_v33 }
  0xe1   :  { %121 = vst [vmem:[%s305_s3 + $0x18] sm:$0xff] %v117_v34  ;;  %224 = vst [vmem:[%s305_s3 + $0x38] sm:$0xff] %v205_v35 }

</bundles_post_ra>
